<compile_context>
chip_gen: v5e
topology: v5e:2x2
jax: 0.10.0
libtpu: 0.0.40
codegen_flags: <defaults>
</compile_context>

<pallas_src>
import functools

import jax
import jax.numpy as jnp
from jax.experimental import pallas as pl
from jax.experimental.pallas import tpu as pltpu


_SQRT_2_OVER_PI = 0.7978845608028654  # sqrt(2 / pi)


def _round_up(x, m):
    return ((x + m - 1) // m) * m


def _gelu_tanh_f32(h):
    # tanh-approximation GELU (matches the PyTorch GELU module in the spec).
    return 0.5 * h * (1.0 + jnp.tanh(_SQRT_2_OVER_PI * (h + 0.044715 * (h * h * h))))


# Per-generation tiling / VMEM policy:
#   v5e : MXU/HBM balance point ~256 rows; 128 MiB VMEM -> spend headroom on th.
#   v6e : 128 MiB VMEM, fast MXU -> large tm to get off the HBM roofline.
#   v7x : 64 MiB VMEM per TC but ~2.3x HBM BW -> modest th, tm ~640 per TC.
_GEN_CFG = {
    "v5e": dict(vmem_limit=100 << 20, tm_target=256, th_min=128),
    "v5p": dict(vmem_limit=100 << 20, tm_target=512, th_min=128),
    "v6e": dict(vmem_limit=100 << 20, tm_target=768, th_min=256),
    "v7x": dict(vmem_limit=52 << 20, tm_target=640, th_min=256),
    "v4": dict(vmem_limit=48 << 20, tm_target=256, th_min=128),
    "unknown": dict(vmem_limit=48 << 20, tm_target=512, th_min=256),
}


def _tpu_generation():
    try:
        kind = jax.devices()[0].device_kind.lower()
    except Exception:
        return "unknown"
    if "v7" in kind:
        return "v7x"
    if "v6" in kind:
        return "v6e"
    if "v5p" in kind:
        return "v5p"
    if "v5" in kind:  # "v5 lite", "v5e", "v5litepod"
        return "v5e"
    if "v4" in kind:
        return "v4"
    return "unknown"


def _select_tiling(M, E_pad, H_pad, dtype, cfg):
    """Pick (tm, th, use_scratch, sublane) for this generation / problem size."""
    itemsize = jnp.dtype(dtype).itemsize
    sublane = {4: 8, 2: 16, 1: 32}.get(itemsize, 8)
    M_sub = _round_up(max(M, 1), sublane)
    f32_out = jnp.dtype(dtype) == jnp.dtype(jnp.float32)

    vmem_budget = int(cfg["vmem_limit"] * 0.85)  # headroom for pipeline internals
    tm_target = cfg["tm_target"]
    th_min = cfg["th_min"]

    w_full = 2 * E_pad * H_pad * itemsize          # one copy of W1 + W2
    bias_bytes = 4 * (H_pad + E_pad) * itemsize    # double-buffered biases (tiny)

    def io_bytes(tm, use_scratch):
        b = 2 * tm * E_pad * itemsize              # x tile (double-buffered)
        b += 2 * tm * E_pad * itemsize             # output tile
        if use_scratch:
            b += tm * E_pad * 4                    # f32 accumulator scratch
        return b + bias_bytes

    # Row-tile candidates (sublane-aligned, clamped to the padded row count) —
    # evaluating several sizes both amortizes weight streaming (big tm) and
    # limits row-padding waste (candidates near M).
    cand = sorted(
        {min(_round_up(min(c, M_sub), sublane), M_sub)
         for c in (tm_target, 1024, 896, 768, 640, 512, 384, 256, 128, sublane)},
        reverse=True,
    )
    th_cands = [c for c in (4096, 2048, 1024, 512, 256, 128)
                if c <= H_pad and H_pad % c == 0]

    best = None  # (score, -tm), tm, th, use_scratch
    for tm in cand:
        M_pad = _round_up(M, tm)
        n_tiles = M_pad // tm
        row_traffic = M_pad * 2 * E_pad * itemsize

        # 1) Weights fully VMEM-resident: collapse the k axis -> weights are
        #    DMA'd exactly once for the whole grid.
        if 2 * w_full + io_bytes(tm, use_scratch=False) <= vmem_budget:
            key = (w_full + row_traffic, -tm)
            if best is None or key < best[0]:
                best = (key, tm, H_pad, False)
            continue

        # 2) Stream the hidden dim in th-sized slices (weights re-streamed per
        #    row tile), f32 outputs accumulate directly into the output tile.
        use_scratch = not f32_out
        weight_budget = vmem_budget - io_bytes(tm, use_scratch)
        fits = [t for t in th_cands if 4 * E_pad * t * itemsize <= weight_budget]
        if not fits:
            continue
        pref = [t for t in fits if t >= th_min]
        th = max(pref) if pref else max(fits)
        # Shallow contraction (th below th_min) half-fills the 256-wide MXU on
        # v6e/v7x; penalize it so a slightly smaller tm that allows th>=256 wins.
        penalty = 0 if (pref or th == H_pad) else n_tiles * w_full
        key = (n_tiles * w_full + row_traffic + penalty, -tm)
        if best is None or key < best[0]:
            best = (key, tm, th, use_scratch)

    if best is None:
        # Extreme fallback (enormous E): smallest tiles, let VMEM limit decide.
        tm = min(cand)
        th = 128 if H_pad % 128 == 0 else H_pad
        return tm, th, (not f32_out), sublane
    _, tm, th, use_scratch = best
    return tm, th, use_scratch, sublane


# ---------------------------- kernel bodies ---------------------------------

def _ffn_kernel_single(x_ref, w1_ref, b1_ref, w2_ref, b2_ref, o_ref, *, compute_dtype):
    # Whole hidden dim in one step (k axis collapsed): no accumulation needed.
    h = jnp.dot(x_ref[...].astype(compute_dtype), w1_ref[...].astype(compute_dtype),
                preferred_element_type=jnp.float32)
    h = h + b1_ref[...].astype(jnp.float32)
    g = _gelu_tanh_f32(h)
    out = jnp.dot(g.astype(compute_dtype), w2_ref[...].astype(compute_dtype),
                  preferred_element_type=jnp.float32)
    o_ref[...] = (out + b2_ref[...].astype(jnp.float32)).astype(o_ref.dtype)


def _ffn_kernel_acc_out(x_ref, w1_ref, b1_ref, w2_ref, b2_ref, o_ref, *, compute_dtype):
    # f32 output: accumulate partial products directly into the VMEM-resident
    # output tile (output block index is constant across k) — no scratch.
    k = pl.program_id(1)

    @pl.when(k == 0)
    def _():
        o_ref[...] = jnp.broadcast_to(b2_ref[...].astype(o_ref.dtype), o_ref.shape)

    h = jnp.dot(x_ref[...].astype(compute_dtype), w1_ref[...].astype(compute_dtype),
                preferred_element_type=jnp.float32)
    h = h + b1_ref[...].astype(jnp.float32)
    g = _gelu_tanh_f32(h)
    o_ref[...] += jnp.dot(g.astype(compute_dtype), w2_ref[...].astype(compute_dtype),
                          preferred_element_type=jnp.float32)


def _ffn_kernel_scratch(x_ref, w1_ref, b1_ref, w2_ref, b2_ref, o_ref, acc_ref, *,
                        compute_dtype):
    # Sub-f32 outputs: keep an f32 accumulator scratch across the k axis.
    k = pl.program_id(1)

    @pl.when(k == 0)
    def _():
        acc_ref[...] = jnp.zeros_like(acc_ref)

    h = jnp.dot(x_ref[...].astype(compute_dtype), w1_ref[...].astype(compute_dtype),
                preferred_element_type=jnp.float32)
    h = h + b1_ref[...].astype(jnp.float32)
    g = _gelu_tanh_f32(h)
    acc_ref[...] += jnp.dot(g.astype(compute_dtype), w2_ref[...].astype(compute_dtype),
                            preferred_element_type=jnp.float32)

    @pl.when(k == pl.num_programs(1) - 1)
    def _():
        o_ref[...] = (acc_ref[...] + b2_ref[...].astype(jnp.float32)).astype(o_ref.dtype)


# ------------------------------- wrapper -------------------------------------

def feed_forward(x, w1, b1, w2, b2, *, matmul_dtype=None):
    """x: (batch, seq, emb_dim) -> (batch, seq, emb_dim).

    w1: (E, H), b1: (H,), w2: (H, E), b2: (E,)  (nn.Linear weights stored
    transposed so the kernel computes plain x @ W).
    matmul_dtype: optionally run the two MXU matmuls in a narrower dtype
    (e.g. jnp.bfloat16) while keeping f32 accumulation and f32 GELU.
    """
    B, S, E = x.shape
    H = w1.shape[1]
    M = B * S
    dtype = x.dtype
    itemsize = jnp.dtype(dtype).itemsize
    compute_dtype = jnp.dtype(matmul_dtype) if matmul_dtype is not None else dtype

    cfg = _GEN_CFG.get(_tpu_generation(), _GEN_CFG["unknown"])

    E_pad = _round_up(E, 128)
    H_pad = _round_up(H, 128)
    tm, th, use_scratch, _ = _select_tiling(M, E_pad, H_pad, dtype, cfg)
    M_pad = _round_up(M, tm)
    n_rows = M_pad // tm
    n_k = H_pad // th

    x2d = x.reshape(M, E)
    if (M_pad, E_pad) != (M, E):
        x2d = jnp.pad(x2d, ((0, M_pad - M), (0, E_pad - E)))
    w1p = jnp.pad(w1, ((0, E_pad - E), (0, H_pad - H))) if (E_pad, H_pad) != (E, H) else w1
    w2p = jnp.pad(w2, ((0, H_pad - H), (0, E_pad - E))) if (E_pad, H_pad) != (E, H) else w2
    b1p = jnp.pad(b1, (0, H_pad - H)).reshape(1, H_pad)
    b2p = jnp.pad(b2, (0, E_pad - E)).reshape(1, E_pad)

    if n_k == 1:
        kernel = functools.partial(_ffn_kernel_single, compute_dtype=compute_dtype)
        scratch_shapes = []
        weight_passes = 1   # constant weight block index -> DMA'd once for the grid
    elif not use_scratch:
        kernel = functools.partial(_ffn_kernel_acc_out, compute_dtype=compute_dtype)
        scratch_shapes = []
        weight_passes = n_rows
    else:
        kernel = functools.partial(_ffn_kernel_scratch, compute_dtype=compute_dtype)
        scratch_shapes = [pltpu.VMEM((tm, E_pad), jnp.float32)]
        weight_passes = n_rows

    # Truthful advisory cost: weights are re-streamed once per row tile.
    cost = pl.CostEstimate(
        flops=4 * M_pad * E_pad * H_pad,
        transcendentals=M_pad * H_pad,
        bytes_accessed=int(
            (2 * M_pad * E_pad
             + weight_passes * (w1p.size + w2p.size)
             + b1p.size + b2p.size) * itemsize),
    )

    out2d = pl.pallas_call(
        kernel,
        out_shape=jax.ShapeDtypeStruct((M_pad, E_pad), dtype),
        grid_spec=pltpu.PrefetchScalarGridSpec(
            num_scalar_prefetch=0,
            grid=(n_rows, n_k),
            in_specs=[
                pl.BlockSpec((tm, E_pad), lambda i, k: (i, 0)),   # x row tile (resident over k)
                pl.BlockSpec((E_pad, th), lambda i, k: (0, k)),   # W1 hidden slice
                pl.BlockSpec((1, th), lambda i, k: (0, k)),       # b1 slice
                pl.BlockSpec((th, E_pad), lambda i, k: (k, 0)),   # W2 hidden slice
                pl.BlockSpec((1, E_pad), lambda i, k: (0, 0)),    # b2 (resident)
            ],
            out_specs=pl.BlockSpec((tm, E_pad), lambda i, k: (i, 0)),
            scratch_shapes=scratch_shapes,
        ),
        compiler_params=pltpu.CompilerParams(
            dimension_semantics=("parallel", "arbitrary"),
            vmem_limit_bytes=int(cfg["vmem_limit"]),
        ),
        cost_estimate=cost,
    )(x2d, w1p, b1p, w2p, b2p)

    return out2d[:M, :E].reshape(B, S, E)


def _reference(x, w1, b1, w2, b2):
    h = jnp.einsum("bse,eh->bsh", x, w1) + b1
    g = 0.5 * h * (1.0 + jnp.tanh(_SQRT_2_OVER_PI * (h + 0.044715 * h ** 3)))
    return jnp.einsum("bsh,he->bse", g, w2) + b2


if __name__ == "__main__":
    # cfg['emb_dim'] = 32  -> hidden = 4 * 32 = 128
    batch, seq, emb_dim = 2, 8, 32
    hidden = 4 * emb_dim

    key = jax.random.PRNGKey(0)
    kx, kw1, kb1, kw2, kb2 = jax.random.split(key, 5)

    x = jax.random.normal(kx, (batch, seq, emb_dim), dtype=jnp.float32)
    # nn.Linear parameters (weights stored transposed: (in_features, out_features))
    w1 = jax.random.normal(kw1, (emb_dim, hidden), dtype=jnp.float32) * 0.02
    b1 = jax.random.normal(kb1, (hidden,), dtype=jnp.float32) * 0.02
    w2 = jax.random.normal(kw2, (hidden, emb_dim), dtype=jnp.float32) * 0.02
    b2 = jax.random.normal(kb2, (emb_dim,), dtype=jnp.float32) * 0.02

    out = feed_forward(x, w1, b1, w2, b2)
    out = jax.block_until_ready(out)

    ref = _reference(x, w1, b1, w2, b2)
    assert out.shape == (batch, seq, emb_dim)
    assert jnp.allclose(out, ref, atol=1e-5, rtol=1e-5), "mismatch vs reference"

    print("KERNEL_OK")
</pallas_src>

<mosaic_0001>
module attributes {stable_mosaic.version = 11 : i64} {
  func.func @_ffn_kernel_single(%arg0: i32, %arg1: i32, %arg2: memref<16x128xf32, #tpu.memory_space<vmem>>, %arg3: memref<128x128xf32, #tpu.memory_space<vmem>>, %arg4: memref<1x128xf32, #tpu.memory_space<vmem>>, %arg5: memref<128x128xf32, #tpu.memory_space<vmem>>, %arg6: memref<1x128xf32, #tpu.memory_space<vmem>>, %arg7: memref<16x128xf32, #tpu.memory_space<vmem>>) attributes {dimension_semantics = [#tpu.dimension_semantics<parallel>, #tpu.dimension_semantics<arbitrary>], iteration_bounds = array<i64: 1, 1>, scalar_prefetch = 0 : i64, scratch_operands = 0 : i64, tpu.core_type = #tpu.core_type<tc>, window_params = [{transform_indices = @transform_0, window_bounds = array<i64: 16, 128>}, {transform_indices = @transform_1, window_bounds = array<i64: 128, 128>}, {transform_indices = @transform_2, window_bounds = array<i64: 1, 128>}, {transform_indices = @transform_3, window_bounds = array<i64: 128, 128>}, {pipeline_mode = #tpu.pipeline_mode<synchronous>, transform_indices = @transform_4, window_bounds = array<i64: 1, 128>}, {transform_indices = @transform_5, window_bounds = array<i64: 16, 128>}]} {
    %c0 = arith.constant 0 : index
    %c0_0 = arith.constant 0 : index
    %0 = vector.load %arg2[%c0, %c0_0] : memref<16x128xf32, #tpu.memory_space<vmem>>, vector<16x128xf32>
    %c0_1 = arith.constant 0 : index
    %c0_2 = arith.constant 0 : index
    %1 = vector.load %arg3[%c0_1, %c0_2] : memref<128x128xf32, #tpu.memory_space<vmem>>, vector<128x128xf32>
    %cst = arith.constant dense<0.000000e+00> : vector<16x128xf32>
    %2 = tpu.matmul %0, %1, %cst {dimension_numbers = #tpu.dot_dimension_numbers<[1], [0], [0], [1], [0, 0, 1, 1], [], []>} : vector<16x128xf32>, vector<128x128xf32>, vector<16x128xf32> -> vector<16x128xf32>
    %c0_3 = arith.constant 0 : index
    %c0_4 = arith.constant 0 : index
    %3 = vector.load %arg4[%c0_3, %c0_4] : memref<1x128xf32, #tpu.memory_space<vmem>>, vector<1x128xf32>
    %4 = vector.broadcast %3 : vector<1x128xf32> to vector<16x128xf32>
    %5 = arith.addf %2, %4 : vector<16x128xf32>
    %cst_5 = arith.constant 5.000000e-01 : f32
    %6 = vector.broadcast %cst_5 : f32 to vector<16x128xf32>
    %7 = arith.mulf %6, %5 : vector<16x128xf32>
    %8 = arith.mulf %5, %5 : vector<16x128xf32>
    %9 = arith.mulf %8, %5 : vector<16x128xf32>
    %cst_6 = arith.constant 4.471500e-02 : f32
    %10 = vector.broadcast %cst_6 : f32 to vector<16x128xf32>
    %11 = arith.mulf %10, %9 : vector<16x128xf32>
    %12 = arith.addf %5, %11 : vector<16x128xf32>
    %cst_7 = arith.constant 0.797884583 : f32
    %13 = vector.broadcast %cst_7 : f32 to vector<16x128xf32>
    %14 = arith.mulf %13, %12 : vector<16x128xf32>
    %15 = math.tanh %14 : vector<16x128xf32>
    %cst_8 = arith.constant 1.000000e+00 : f32
    %16 = vector.broadcast %cst_8 : f32 to vector<16x128xf32>
    %17 = arith.addf %16, %15 : vector<16x128xf32>
    %18 = arith.mulf %7, %17 : vector<16x128xf32>
    %c0_9 = arith.constant 0 : index
    %c0_10 = arith.constant 0 : index
    %19 = vector.load %arg5[%c0_9, %c0_10] : memref<128x128xf32, #tpu.memory_space<vmem>>, vector<128x128xf32>
    %cst_11 = arith.constant dense<0.000000e+00> : vector<16x128xf32>
    %20 = tpu.matmul %18, %19, %cst_11 {dimension_numbers = #tpu.dot_dimension_numbers<[1], [0], [0], [1], [0, 0, 1, 1], [], []>} : vector<16x128xf32>, vector<128x128xf32>, vector<16x128xf32> -> vector<16x128xf32>
    %c0_12 = arith.constant 0 : index
    %c0_13 = arith.constant 0 : index
    %21 = vector.load %arg6[%c0_12, %c0_13] : memref<1x128xf32, #tpu.memory_space<vmem>>, vector<1x128xf32>
    %22 = vector.broadcast %21 : vector<1x128xf32> to vector<16x128xf32>
    %23 = arith.addf %20, %22 : vector<16x128xf32>
    %c0_14 = arith.constant 0 : index
    %c0_15 = arith.constant 0 : index
    %24 = vector.load %arg7[%c0_14, %c0_15] : memref<16x128xf32, #tpu.memory_space<vmem>>, vector<16x128xf32>
    tpu.vector_store %arg7[%c0_14, %c0_15], %23 {strides = array<i32>} : memref<16x128xf32, #tpu.memory_space<vmem>>, vector<16x128xf32>,
    return
  }
  func.func @transform_0(%arg0: i32, %arg1: i32) -> (i32, i32) {
    %c0_i32 = arith.constant 0 : i32
    %c0_i32_0 = arith.constant 0 : i32
    return %arg0, %c0_i32 : i32, i32
  }
  func.func @transform_1(%arg0: i32, %arg1: i32) -> (i32, i32) {
    %c0_i32 = arith.constant 0 : i32
    %c0_i32_0 = arith.constant 0 : i32
    return %c0_i32, %arg1 : i32, i32
  }
  func.func @transform_2(%arg0: i32, %arg1: i32) -> (i32, i32) {
    %c0_i32 = arith.constant 0 : i32
    %c0_i32_0 = arith.constant 0 : i32
    return %c0_i32, %arg1 : i32, i32
  }
  func.func @transform_3(%arg0: i32, %arg1: i32) -> (i32, i32) {
    %c0_i32 = arith.constant 0 : i32
    %c0_i32_0 = arith.constant 0 : i32
    return %arg1, %c0_i32 : i32, i32
  }
  func.func @transform_4(%arg0: i32, %arg1: i32) -> (i32, i32) {
    %c0_i32 = arith.constant 0 : i32
    %c0_i32_0 = arith.constant 0 : i32
    %c0_i32_1 = arith.constant 0 : i32
    return %c0_i32, %c0_i32_0 : i32, i32
  }
  func.func @transform_5(%arg0: i32, %arg1: i32) -> (i32, i32) {
    %c0_i32 = arith.constant 0 : i32
    %c0_i32_0 = arith.constant 0 : i32
    return %arg0, %c0_i32 : i32, i32
  }
}

</mosaic_0001>

<bundles_post_ra>
// kernel: tpu_custom_call.1
= control target key start
LH: loop header
LB: loop body
LE: loop exit
PB: predicated region body
PF: predicated region fallthrough
CT: control target
= control target key end

     0   :  { %10 = vsyncpa [#allocation3], 0  ;;  %s408_s0 = inlined_call_operand.hbm [shape: f32[16,128], index: 0, kind: input, shape index: {}]   ;;  %s409_s1 = inlined_call_operand.hbm [shape: f32[128,128], index: 1, kind: input, shape index: {}]   ;;  %s410_s2 = inlined_call_operand.vmem [shape: f32[1,128], index: 2, kind: input, shape index: {}]   ;;  %s411_s3 = inlined_call_operand.hbm [shape: f32[128,128], index: 3, kind: input, shape index: {}]   ;;  %s412_s4 = inlined_call_operand.vmem [shape: f32[1,128], index: 4, kind: input, shape index: {}]   ;;  %s413_s5 = inlined_call_operand.hbm [shape: f32[16,128], index: 5, kind: output, shape index: {}]  }
   0x1   :  { %11 = vsyncpa [#allocation6], 0 }
   0x2   :  { %12 = vsyncpa [#allocation4], 0  ;;  %s30_s20 = sshll.u32 %s409_s1, 4  ;;  %s342_s21 = smov [#allocation5]   ;;  %s31_s20 = int_to_ptr.hbm [resolvable:$true] %s30_s20 }
   0x3   :  { %s32_s22 = sshll.u32 %s342_s21, 4  ;;  %s17_s25 = sshll.u32 %s408_s0, 4  ;;  %s33_s22 = int_to_ptr.vmem [resolvable:$true] %s32_s22  ;;  %s18_s25 = int_to_ptr.hbm [resolvable:$true] %s17_s25 }
   0x4   :  { %s343_s26 = smov 128   ;;  %s344_s27 = smov 8  }
   0x5   :  { %38 = dma.hbm_to_vmem [thread:$0]  %s31_s20, 2048, %s33_s22, [#allocation6], %s343_s26, %s343_s26, %s344_s27  }
   0x6   :  { %s345_s28 = smov [#allocation2]   ;;  %s45_s1 = sshll.u32 %s411_s3, 4  ;;  %s46_s1 = int_to_ptr.hbm [resolvable:$true] %s45_s1 }
   0x7   :  { %s19_s29 = sshll.u32 %s345_s28, 4  ;;  %s346_s0 = smov [#allocation7]   ;;  %s20_s29 = int_to_ptr.vmem [resolvable:$true] %s19_s29 }
   0x8   :  { %25 = dma.hbm_to_vmem [thread:$0]  %s18_s25, 256, %s20_s29, [#allocation3], %s343_s26, %s343_s26, %s344_s27  }
   0x9   :  { %s47_s7 = sshll.u32 %s346_s0, 4  ;;  %s48_s7 = int_to_ptr.vmem [resolvable:$true] %s47_s7 }
   0xa   :  { %53 = dma.hbm_to_vmem [thread:$0]  %s46_s1, 2048, %s48_s7, [#allocation6], %s343_s26, %s343_s26, %s344_s27  }
   0xb   :  { %336 = dma.done.wait [#allocation3], 256  }
   0xc   :  { %337 = vsyncadd [#allocation3], 4294967040 }
   0xd   :  { %338 = dma.done.wait [#allocation6], 4096  }
   0xe   :  { %339 = vsyncadd [#allocation6], 4294963200  ;;  %v85_v0 = vld [vmem:[#allocation5 + $0x78] sm:$0xff]  ;;  %v84_v1 = vld [vmem:[#allocation5 + $0x70] sm:$0xff]  ;;  %s347_s10 = smov [#allocation8]   ;;  %s182_s14 = sshll.u32 %s413_s5, 4  ;;  %s183_s14 = int_to_ptr.hbm [resolvable:$true] %s182_s14 }
   0xf   :  { %90 = vmatpush.msra.mxu0 %v85_v0  ;;  %196 = vmatpush.msra.mxu2 %v85_v0  ;;  %v83_v2 = vld [vmem:[#allocation5 + $0x68] sm:$0xff]  ;;  %v82_v3 = vld [vmem:[#allocation5 + $0x60] sm:$0xff]  ;;  %v81_v4 = vld [vmem:[#allocation5 + $0x58] sm:$0xff]  ;;  %s180_s11 = sshll.u32 %s347_s10, 4  ;;  %s181_s11 = int_to_ptr.vmem [resolvable:$true] %s180_s11 }
  0x10   :  { %v146_v5 = vld [vmem:[#allocation7 + $0x78] sm:$0xff]  ;;  %v145_v6 = vld [vmem:[#allocation7 + $0x70] sm:$0xff]  ;;  %v144_v8 = vld [vmem:[#allocation7 + $0x68] sm:$0xff] }
  0x11   :  { %91 = vmatpush.msra.mxu0 %v84_v1  ;;  %197 = vmatpush.msra.mxu2 %v84_v1  ;;  %v80_v7 = vld [vmem:[#allocation5 + $0x50] sm:$0xff]  ;;  %v79_v9 = vld [vmem:[#allocation5 + $0x48] sm:$0xff]  ;;  %v143_v10 = vld [vmem:[#allocation7 + $0x60] sm:$0xff] }
  0x12   :  { %151 = vmatpush.msra.mxu1 %v146_v5  ;;  %212 = vmatpush.msra.mxu3 %v146_v5  ;;  %v78_v11 = vld [vmem:[#allocation5 + $0x40] sm:$0xff]  ;;  %v77_v12 = vld [vmem:[#allocation5 + $0x38] sm:$0xff]  ;;  %v76_v13 = vld [vmem:[#allocation5 + $0x30] sm:$0xff] }
  0x13   :  { %92 = vmatpush.msra.mxu0 %v83_v2  ;;  %198 = vmatpush.msra.mxu2 %v83_v2  ;;  %v75_v14 = vld [vmem:[#allocation5 + $0x28] sm:$0xff]  ;;  %v74_v15 = vld [vmem:[#allocation5 + $0x20] sm:$0xff]  ;;  %v73_v16 = vld [vmem:[#allocation5 + $0x18] sm:$0xff] }
  0x14   :  { %152 = vmatpush.msra.mxu1 %v145_v6  ;;  %213 = vmatpush.msra.mxu3 %v145_v6  ;;  %v72_v17 = vld [vmem:[#allocation5 + $0x10] sm:$0xff]  ;;  %v71_v18 = vld [vmem:[#allocation5 + $0x8] sm:$0xff]  ;;  %v70_v19 = vld [vmem:[#allocation5] sm:$0xff] }
  0x15   :  { %93 = vmatpush.msra.mxu0 %v82_v3  ;;  %199 = vmatpush.msra.mxu2 %v82_v3  ;;  %v68_v20 = vld [vmem:[#allocation2] sm:$0xff]  ;;  %v69_v21 = vld [vmem:[#allocation2 + $0x8] sm:$0xff]  ;;  %v140_v24 = vld [vmem:[#allocation7 + $0x48] sm:$0xff] }
  0x16   :  { %153 = vmatpush.msra.mxu1 %v144_v8  ;;  %214 = vmatpush.msra.mxu3 %v144_v8  ;;  %v142_v22 = vld [vmem:[#allocation7 + $0x58] sm:$0xff]  ;;  %v141_v23 = vld [vmem:[#allocation7 + $0x50] sm:$0xff]  ;;  %v139_v25 = vld [vmem:[#allocation7 + $0x40] sm:$0xff] }
  0x17   :  { %94 = vmatpush.msra.mxu0 %v81_v4  ;;  %200 = vmatpush.msra.mxu2 %v81_v4  ;;  %v138_v26 = vld [vmem:[#allocation7 + $0x38] sm:$0xff]  ;;  %v137_v27 = vld [vmem:[#allocation7 + $0x30] sm:$0xff]  ;;  %v136_v28 = vld [vmem:[#allocation7 + $0x28] sm:$0xff] }
  0x18   :  { %154 = vmatpush.msra.mxu1 %v143_v10  ;;  %215 = vmatpush.msra.mxu3 %v143_v10  ;;  %v135_v29 = vld [vmem:[#allocation7 + $0x20] sm:$0xff]  ;;  %v134_v30 = vld [vmem:[#allocation7 + $0x18] sm:$0xff]  ;;  %v133_v31 = vld [vmem:[#allocation7 + $0x10] sm:$0xff] }
  0x19   :  { %95 = vmatpush.msra.mxu0 %v80_v7  ;;  %201 = vmatpush.msra.mxu2 %v80_v7  ;;  %v132_v32 = vld [vmem:[#allocation7 + $0x8] sm:$0xff]  ;;  %v131_v33 = vld [vmem:[#allocation7] sm:$0xff]  ;;  %v234_v34 = vld [vmem:[%s410_s2] ss:$0 sm:$0xff] }
  0x1a   :  { %155 = vmatpush.msra.mxu1 %v142_v22  ;;  %216 = vmatpush.msra.mxu3 %v142_v22  ;;  %v235_v57 = vld [vmem:[%s412_s4] ss:$0 sm:$0xff] }
  0x1b   :  { %96 = vmatpush.msra.mxu0 %v79_v9  ;;  %202 = vmatpush.msra.mxu2 %v79_v9 }
  0x1c   :  { %156 = vmatpush.msra.mxu1 %v141_v23  ;;  %217 = vmatpush.msra.mxu3 %v141_v23 }
  0x1d   :  { %97 = vmatpush.msra.mxu0 %v78_v11  ;;  %203 = vmatpush.msra.mxu2 %v78_v11 }
  0x1e   :  { %157 = vmatpush.msra.mxu1 %v140_v24  ;;  %218 = vmatpush.msra.mxu3 %v140_v24 }
  0x1f   :  { %98 = vmatpush.msra.mxu0 %v77_v12  ;;  %204 = vmatpush.msra.mxu2 %v77_v12 }
  0x20   :  { %158 = vmatpush.msra.mxu1 %v139_v25  ;;  %219 = vmatpush.msra.mxu3 %v139_v25 }
  0x21   :  { %99 = vmatpush.msra.mxu0 %v76_v13  ;;  %205 = vmatpush.msra.mxu2 %v76_v13 }
  0x22   :  { %159 = vmatpush.msra.mxu1 %v138_v26  ;;  %220 = vmatpush.msra.mxu3 %v138_v26 }
  0x23   :  { %100 = vmatpush.msra.mxu0 %v75_v14  ;;  %206 = vmatpush.msra.mxu2 %v75_v14 }
  0x24   :  { %160 = vmatpush.msra.mxu1 %v137_v27  ;;  %221 = vmatpush.msra.mxu3 %v137_v27 }
  0x25   :  { %101 = vmatpush.msra.mxu0 %v74_v15  ;;  %207 = vmatpush.msra.mxu2 %v74_v15 }
  0x26   :  { %161 = vmatpush.msra.mxu1 %v136_v28  ;;  %222 = vmatpush.msra.mxu3 %v136_v28 }
  0x27   :  { %102 = vmatpush.msra.mxu0 %v73_v16  ;;  %208 = vmatpush.msra.mxu2 %v73_v16 }
  0x28   :  { %162 = vmatpush.msra.mxu1 %v135_v29  ;;  %223 = vmatpush.msra.mxu3 %v135_v29 }
  0x29   :  { %103 = vmatpush.msra.mxu0 %v72_v17  ;;  %209 = vmatpush.msra.mxu2 %v72_v17 }
  0x2a   :  { %163 = vmatpush.msra.mxu1 %v134_v30  ;;  %224 = vmatpush.msra.mxu3 %v134_v30 }
  0x2b   :  { %104 = vmatpush.msra.mxu0 %v71_v18  ;;  %210 = vmatpush.msra.mxu2 %v71_v18 }
  0x2c   :  { %164 = vmatpush.msra.mxu1 %v133_v31  ;;  %225 = vmatpush.msra.mxu3 %v133_v31 }
  0x2d   :  { %105 = vmatpush.msra.mxu0 %v70_v19  ;;  %211 = vmatpush.msra.mxu2 %v70_v19 }
  0x2e   :  { %106 = vmatmul.f32.vlgmr.msra.gmra.mxu0 %v68_v20  ;;  %109 = vmatmul.f32.vlgmr.msra.gmra.mxu2 %v69_v21 }
  0x2f   :  { %165 = vmatpush.msra.mxu1 %v132_v32  ;;  %226 = vmatpush.msra.mxu3 %v132_v32 }
  0x31   :  { %166 = vmatpush.msra.mxu1 %v131_v33  ;;  %227 = vmatpush.msra.mxu3 %v131_v33 }
  0xab   :  { %v107_v35 = vpop.f32.mrf.mxu0 }
  0xac   :  { %v108_v36 = vadd.f32 %v234_v34, %v107_v35 }
  0xae   :  { %v115_v37 = vmul.f32 %v108_v36, %v108_v36  ;;  %v113_v50 = vmul.f32 0.5, %v108_v36 }
  0xb0   :  { %v117_v38 = vmul.f32 %v115_v37, %v108_v36 }
  0xb1   :  { %v110_v39 = vpop.f32.mrf.mxu2 }
  0xb2   :  { %v111_v40 = vadd.f32 %v234_v34, %v110_v39  ;;  %v119_v41 = vmul.f32 0.044715, %v117_v38 }
  0xb4   :  { %v116_v42 = vmul.f32 %v111_v40, %v111_v40  ;;  %v121_v43 = vadd.f32 %v119_v41, %v108_v36  ;;  %v114_v54 = vmul.f32 0.5, %v111_v40 }
  0xb6   :  { %v118_v44 = vmul.f32 %v116_v42, %v111_v40  ;;  %v123_v45 = vmul.f32 0.7978846, %v121_v43 }
  0xb8   :  { %236 = vtanh.f32 %v123_v45  ;;  %v120_v46 = vmul.f32 0.044715, %v118_v44 }
  0xba   :  { %v122_v47 = vadd.f32 %v120_v46, %v111_v40 }
  0xbc   :  { %v124_v48 = vmul.f32 0.7978846, %v122_v47 }
  0xbe   :  { %v237_v49 = vpop.eup %236  ;;  %238 = vtanh.f32 %v124_v48 }
  0xbf   :  { %v127_v51 = vadd.f32 1.0, %v237_v49 }
  0xc1   :  { %v129_v52 = vmul.f32 %v127_v51, %v113_v50 }
  0xc3   :  { %167 = vmatmul.f32.vlgmr.msra.gmra.mxu1 %v129_v52 }
  0xc4   :  { %v239_v53 = vpop.eup %238 }
  0xc5   :  { %v128_v55 = vadd.f32 1.0, %v239_v53 }
  0xc7   :  { %v130_v56 = vmul.f32 %v128_v55, %v114_v54 }
  0xc9   :  { %170 = vmatmul.f32.vlgmr.msra.gmra.mxu3 %v130_v56 }
 0x140   :  { %v168_v58 = vpop.f32.mrf.mxu1 }
 0x141   :  { %v169_v59 = vadd.f32 %v235_v57, %v168_v58 }
 0x143   :  { %174 = vst [vmem:[#allocation8] sm:$0xff] %v169_v59 }
 0x14c   :  { %v171_v60 = vpop.f32.mrf.mxu3 }
 0x14d   :  { %v172_v61 = vadd.f32 %v235_v57, %v171_v60 }
 0x14f   :  { %175 = vst [vmem:[#allocation8 + $0x8] sm:$0xff] %v172_v61 }
 0x150   :  { %188 = dma.vmem_to_hbm [thread:$0]  %s181_s11, 256, %s183_s14, [#allocation4], %s343_s26, %s343_s26, %s344_s27  }
 0x151   :  { %340 = dma.done.wait [#allocation4], 256  }
 0x152   :  { %341 = vsyncadd [#allocation4], 4294967040 }
 0x153   :  { %193 = vsyncpa [#allocation3], 1 }
 0x154   :  { %194 = vsyncpa [#allocation6], 1 }
 0x155   :  { %195 = vsyncpa [#allocation4], 1 }

</bundles_post_ra>
